<compile_context>
chip_gen: v5e
topology: v5e:2x2
jax: 0.10.0
libtpu: 0.0.40
codegen_flags: <defaults>
</compile_context>

<pallas_src>
import jax
import jax.numpy as jnp
from jax.experimental import pallas as pl
from jax.experimental.pallas import tpu as pltpu


def _lock_dropout_kernel(mask_ref, x_ref, o_ref):
    # mask_ref: (1, B*H), x_ref / o_ref: (tT, B*H).  Broadcast multiply.
    o_ref[...] = x_ref[...] * mask_ref[...]


def make_lock_dropout_mask(key, batch, hidden, rate, dtype):
    """Bernoulli(1-rate) keep mask, pre-scaled by 1/(1-rate), shape (1, B*H)."""
    keep = jax.random.bernoulli(key, p=1.0 - rate, shape=(1, batch * hidden))
    scale = jnp.asarray(1.0 / (1.0 - rate), dtype=dtype)
    return keep.astype(dtype) * scale


def _pick_time_tile(T, row_bytes, requested=None, target_bytes=2 * 1024 * 1024):
    """~2 MiB blocks; sublane-aligned (multiple of 8) unless the tile covers T."""
    if requested is not None:
        return min(requested, T)
    tT = max(1, min(T, target_bytes // max(row_bytes, 1)))
    if tT < T:
        tT = max(8, (tT // 8) * 8)  # keep (8,128) block constraint satisfied
        if tT >= T:
            tT = T
    return tT


def lock_dropout(x, *, key, rate=0.5, training=True, time_tile=None):
    """Pallas LockDropout forward.  x: (T, B, H)."""
    if rate == 0.0 or not training:
        return x

    T, B, H = x.shape
    BH = B * H
    itemsize = jnp.dtype(x.dtype).itemsize

    # Lane-dense 2D view (free reshape: contiguous).
    x2 = x.reshape(T, BH)
    mask = make_lock_dropout_mask(key, B, H, rate, x.dtype)  # (1, BH)

    tT = _pick_time_tile(T, BH * itemsize, time_tile)
    grid_t = pl.cdiv(T, tT)

    out2 = pl.pallas_call(
        _lock_dropout_kernel,
        out_shape=jax.ShapeDtypeStruct((T, BH), x.dtype),
        grid=(grid_t,),
        in_specs=[
            pl.BlockSpec((1, BH), lambda t: (0, 0)),    # mask: VMEM-resident
            pl.BlockSpec((tT, BH), lambda t: (t, 0)),   # x time-tile
        ],
        out_specs=pl.BlockSpec((tT, BH), lambda t: (t, 0)),
        compiler_params=pltpu.CompilerParams(
            # No cross-step state -> time tiles can be sharded across cores.
            dimension_semantics=("parallel",),
        ),
    )(mask, x2)

    return out2.reshape(T, B, H)


if __name__ == "__main__":
    key = jax.random.PRNGKey(0)
    kx, km = jax.random.split(key)

    T, B, H = 8, 2, 32
    x = jax.random.normal(kx, (T, B, H), dtype=jnp.float32)
    rate = 0.5

    out = lock_dropout(x, key=km, rate=rate, training=True)
    out = jax.block_until_ready(out)
    assert out.shape == x.shape

    # Reference: same mask (same key), broadcast over time.
    mask_ref = make_lock_dropout_mask(km, B, H, rate, x.dtype).reshape(1, B, H)
    ref = x * mask_ref
    assert bool(jnp.allclose(out, ref, atol=1e-6, rtol=1e-6)), "mismatch vs reference"

    # "Locked" semantics: the implied mask is identical across the time axis
    # and its values lie in {0, 1/(1-rate)}.
    scale = 1.0 / (1.0 - rate)
    m = jnp.broadcast_to(mask_ref, x.shape)
    assert bool(jnp.all(jnp.abs(m - m[0:1]) == 0.0)), "mask not shared across time"
    assert bool(jnp.all((m == 0.0) | (jnp.abs(m - scale) < 1e-6))), "bad mask values"

    # Eval / rate==0 paths return the input unchanged.
    assert bool(jnp.all(lock_dropout(x, key=km, rate=rate, training=False) == x))
    assert bool(jnp.all(lock_dropout(x, key=km, rate=0.0, training=True) == x))

    print("KERNEL_OK")
</pallas_src>

<mosaic_0001>
module attributes {stable_mosaic.version = 11 : i64} {
  func.func @_lock_dropout_kernel(%arg0: i32, %arg1: memref<1x64xf32, #tpu.memory_space<vmem>>, %arg2: memref<8x64xf32, #tpu.memory_space<vmem>>, %arg3: memref<8x64xf32, #tpu.memory_space<vmem>>) attributes {dimension_semantics = [#tpu.dimension_semantics<parallel>], iteration_bounds = array<i64: 1>, scalar_prefetch = 0 : i64, scratch_operands = 0 : i64, tpu.core_type = #tpu.core_type<tc>, window_params = [{pipeline_mode = #tpu.pipeline_mode<synchronous>, transform_indices = @transform_0, window_bounds = array<i64: 1, 64>}, {transform_indices = @transform_1, window_bounds = array<i64: 8, 64>}, {transform_indices = @transform_2, window_bounds = array<i64: 8, 64>}]} {
    %c0 = arith.constant 0 : index
    %c0_0 = arith.constant 0 : index
    %0 = vector.load %arg2[%c0, %c0_0] : memref<8x64xf32, #tpu.memory_space<vmem>>, vector<8x64xf32>
    %c0_1 = arith.constant 0 : index
    %c0_2 = arith.constant 0 : index
    %1 = vector.load %arg1[%c0_1, %c0_2] : memref<1x64xf32, #tpu.memory_space<vmem>>, vector<1x64xf32>
    %2 = vector.broadcast %1 : vector<1x64xf32> to vector<8x64xf32>
    %3 = arith.mulf %0, %2 : vector<8x64xf32>
    %c0_3 = arith.constant 0 : index
    %c0_4 = arith.constant 0 : index
    %4 = vector.load %arg3[%c0_3, %c0_4] : memref<8x64xf32, #tpu.memory_space<vmem>>, vector<8x64xf32>
    tpu.vector_store %arg3[%c0_3, %c0_4], %3 {strides = array<i32>} : memref<8x64xf32, #tpu.memory_space<vmem>>, vector<8x64xf32>,
    return
  }
  func.func @transform_0(%arg0: i32) -> (i32, i32) {
    %c0_i32 = arith.constant 0 : i32
    %c0_i32_0 = arith.constant 0 : i32
    %c0_i32_1 = arith.constant 0 : i32
    return %c0_i32, %c0_i32_0 : i32, i32
  }
  func.func @transform_1(%arg0: i32) -> (i32, i32) {
    %c0_i32 = arith.constant 0 : i32
    %c0_i32_0 = arith.constant 0 : i32
    return %arg0, %c0_i32 : i32, i32
  }
  func.func @transform_2(%arg0: i32) -> (i32, i32) {
    %c0_i32 = arith.constant 0 : i32
    %c0_i32_0 = arith.constant 0 : i32
    return %arg0, %c0_i32 : i32, i32
  }
}

</mosaic_0001>

<bundles_post_ra>
// kernel: tpu_custom_call.1
= control target key start
LH: loop header
LB: loop body
LE: loop exit
PB: predicated region body
PF: predicated region fallthrough
CT: control target
= control target key end

     0   :  { %7 = vsyncpa [#allocation3], 0  ;;  %s175_s0 = inlined_call_operand.hbm [shape: f32[1,64], index: 0, kind: input, shape index: {}]   ;;  %s176_s1 = inlined_call_operand.hbm [shape: f32[8,64], index: 1, kind: input, shape index: {}]   ;;  %s177_s2 = inlined_call_operand.hbm [shape: f32[8,64], index: 2, kind: output, shape index: {}]  }
   0x1   :  { %8 = vsyncpa [#allocation6], 0 }
   0x2   :  { %9 = vsyncpa [#allocation4], 0  ;;  %s15_s11 = sshll.u32 %s175_s0, 4  ;;  %s148_s12 = smov [#allocation2]   ;;  %s16_s11 = int_to_ptr.hbm [resolvable:$true] %s15_s11 }
   0x3   :  { %s17_s13 = sshll.u32 %s148_s12, 4  ;;  %s26_s16 = sshll.u32 %s176_s1, 4  ;;  %s18_s13 = int_to_ptr.vmem [resolvable:$true] %s17_s13  ;;  %s27_s16 = int_to_ptr.hbm [resolvable:$true] %s26_s16 }
   0x4   :  { %20 = dma.hbm_to_vmem [thread:$0]  %s16_s11, 16, %s18_s13, [#allocation3]  }
   0x5   :  { %s149_s17 = smov [#allocation5]  }
   0x6   :  { %s28_s18 = sshll.u32 %s149_s17, 4  ;;  %s29_s18 = int_to_ptr.vmem [resolvable:$true] %s28_s18 }
   0x7   :  { %31 = dma.hbm_to_vmem [thread:$0]  %s27_s16, 128, %s29_s18, [#allocation6]  }
   0x8   :  { %142 = dma.done.wait [#allocation3], 16  }
   0x9   :  { %143 = vsyncadd [#allocation3], 4294967280 }
   0xa   :  { %144 = dma.done.wait [#allocation6], 128  }
   0xb   :  { %145 = vsyncadd [#allocation6], 4294967168  ;;  %s150_s19 = smov [#allocation7]   ;;  %s55_s22 = sshll.u32 %s177_s2, 4  ;;  %v40_v0 = vld [vmem:[#allocation5] sm:$0xff]  ;;  %vm46_vm0 = vcmask 523264   ;;  %s56_s22 = int_to_ptr.hbm [resolvable:$true] %s55_s22 }
   0xc   :  { %s53_s0 = sshll.u32 %s150_s19, 4  ;;  %v69_v1 = vld [vmem:[#allocation2] ss:$0 sm:$0xff]  ;;  %s54_s0 = int_to_ptr.vmem [resolvable:$true] %s53_s0 }
   0xd   :  { %v45_v2 = vmul.f32 %v69_v1, %v40_v0 }
   0xf   :  { %47 = vst.msk [vmem:[#allocation7] sm:$0xff] %vm46_vm0, %v45_v2 }
  0x10   :  { %58 = dma.vmem_to_hbm [thread:$0]  %s54_s0, 128, %s56_s22, [#allocation4]  }
  0x11   :  { %146 = dma.done.wait [#allocation4], 128  }
  0x12   :  { %147 = vsyncadd [#allocation4], 4294967168 }
  0x13   :  { %63 = vsyncpa [#allocation3], 1 }
  0x14   :  { %64 = vsyncpa [#allocation6], 1 }
  0x15   :  { %65 = vsyncpa [#allocation4], 1 }

</bundles_post_ra>
